<compile_context>
chip_gen: v7x
topology: tpu7x:2x2x1
jax: 0.10.0
libtpu: 0.0.40
codegen_flags: <defaults>
</compile_context>

<pallas_src>
from functools import partial

import jax
import jax.numpy as jnp
from jax.experimental import pallas as pl
from jax.experimental.pallas import tpu as pltpu


def _sigmoid_prod_pool_kernel(x_ref, w_ref, b_ref, o_ref, *, n_reads):
    # x_ref: (TB, R*C) VMEM (lane-dense)   w_ref: (1, C) VMEM
    # b_ref: (1, 1)    SMEM                o_ref: (1, 1, TB) VMEM, float32
    c = w_ref.shape[-1]
    w = w_ref[...].astype(jnp.float32)                               # (1, C)
    b = b_ref[0, 0]                                                  # scalar

    # Log-space product pooling:
    #   1 - sigmoid(z) = exp(-softplus(z))
    #   1 - prod_r(1 - sigmoid(z_r)) = 1 - exp(-sum_r softplus(z_r))
    # R static lane-segment sums over the flattened block; each segment is a
    # static ref slice (no padded (8,128) per-read tiles, exact f32 math).
    neg_log_q = jnp.zeros((x_ref.shape[0], 1), jnp.float32)
    for r in range(n_reads):                                         # small static unroll
        seg = x_ref[:, r * c:(r + 1) * c].astype(jnp.float32)        # (TB, C)
        logit = jnp.sum(seg * w, axis=-1, keepdims=True) + b         # (TB, 1)
        neg_log_q = neg_log_q + jax.nn.softplus(logit)
    site = 1.0 - jnp.exp(-neg_log_q)                                 # (TB, 1)

    # Lane-dense store: one (1, 1, TB) row per grid step.
    o_ref[...] = jnp.transpose(site)[None, :, :].astype(o_ref.dtype)


def _vmem_limit_bytes():
    """Generation-aware scoped-VMEM limit (v7x has only 64 MiB per TensorCore)."""
    cap = 128 * 1024 * 1024
    try:
        cap = int(pltpu.get_tpu_info().vmem_capacity_bytes)
    except Exception:
        pass
    return int(min(32 * 1024 * 1024, cap // 2))


def _pick_block_b(B, feat, vmem_limit):
    """Batch tile size from padded-footprint VMEM budget + roofline/grid caps."""
    # Padded VMEM bytes per batch row of the flattened f32 (B, feat) input:
    # the lane (minor) dim is stored in multiples of 128.
    per_row_bytes = pl.cdiv(feat, 128) * 128 * 4
    # x is double-buffered and the elementwise/softplus intermediates need
    # headroom, so each input buffer gets at most min(4 MiB, limit / 8).
    budget = min(4 * 1024 * 1024, vmem_limit // 8)
    tb = max(8, budget // per_row_bytes)
    # HBM roofline saturates at 512-1024-row tiles; bigger only adds pressure.
    tb = min(tb, 1024)
    # Keep >= 4 grid steps whenever B permits (v7x 2-core sharding + overlap).
    tb = min(tb, max(8, pl.cdiv(B, 4)))
    tb = min(tb, B)
    if tb < B:
        tb = min(B, max(8, (tb // 8) * 8))       # sublane-aligned partial tiles
    return max(1, int(tb))


def sigmoid_prod_pooling(x, w, b, *, block_b=None):
    """x: (B, R, C), w: (1, C), b: (1, 1) -> (B, 1) float32."""
    B, R, C = x.shape
    feat = R * C

    vmem_limit = _vmem_limit_bytes()
    if block_b is None:
        block_b = _pick_block_b(B, feat, vmem_limit)
    block_b = int(max(1, min(block_b, B)))
    if block_b < B and block_b % 8 != 0:         # keep sublane alignment
        block_b = min(B, max(8, (block_b // 8) * 8))

    nb = pl.cdiv(B, block_b)

    # Free reshape of contiguous HBM; no jnp.pad copy (ragged last block is
    # tolerated: garbage rows are independent and sliced off below).
    x_flat = x.reshape(B, feat)
    b = b.reshape(1, 1).astype(jnp.float32)

    out = pl.pallas_call(
        partial(_sigmoid_prod_pool_kernel, n_reads=R),
        out_shape=jax.ShapeDtypeStruct((nb, 1, block_b), jnp.float32),
        grid_spec=pltpu.PrefetchScalarGridSpec(
            num_scalar_prefetch=0,
            grid=(nb,),
            in_specs=[
                pl.BlockSpec((block_b, feat), lambda i: (i, 0)),
                pl.BlockSpec((1, C), lambda i: (0, 0)),
                pl.BlockSpec(memory_space=pltpu.MemorySpace.SMEM),
            ],
            out_specs=pl.BlockSpec((1, 1, block_b), lambda i: (i, 0, 0)),
        ),
        compiler_params=pltpu.CompilerParams(
            dimension_semantics=("parallel",),
            vmem_limit_bytes=vmem_limit,
        ),
    )(x_flat, w, b)

    return out.reshape(nb * block_b, 1)[:B]


def reference(x, w, b):
    logits = jnp.einsum("brc,c->br", x.astype(jnp.float32), w[0]) + b[0, 0]
    p = jax.nn.sigmoid(logits)
    return 1.0 - jnp.prod(1.0 - p, axis=1, keepdims=True)


if __name__ == "__main__":
    # Module hyper-params (synthetic, deterministic init).
    input_channel = 32
    n_reads_per_site = 5
    batch = 2

    key = jax.random.PRNGKey(0)
    kx, kw, kb, kx2 = jax.random.split(key, 4)

    # Input: (B, R, C)
    x = jax.random.normal(kx, (batch, n_reads_per_site, input_channel),
                          dtype=jnp.float32)

    # nn.Linear(input_channel, 1) default init: U(-1/sqrt(C), 1/sqrt(C)).
    bound = 1.0 / (input_channel ** 0.5)
    w = jax.random.uniform(kw, (1, input_channel), dtype=jnp.float32,
                           minval=-bound, maxval=bound)
    b = jax.random.uniform(kb, (1, 1), dtype=jnp.float32,
                           minval=-bound, maxval=bound)

    out = jax.block_until_ready(sigmoid_prod_pooling(x, w, b))
    ref = reference(x, w, b)
    assert out.shape == (batch, 1), out.shape
    assert jnp.allclose(out, ref, atol=1e-5, rtol=1e-5), (out, ref)

    # Multi-block grid with a ragged (non-divisible) last block — no pad copy.
    batch2 = 200
    x2 = jax.random.normal(kx2, (batch2, n_reads_per_site, input_channel),
                           dtype=jnp.float32)
    out2 = jax.block_until_ready(sigmoid_prod_pooling(x2, w, b, block_b=64))
    ref2 = reference(x2, w, b)
    assert out2.shape == (batch2, 1), out2.shape
    assert jnp.allclose(out2, ref2, atol=1e-5, rtol=1e-5)

    # Default (auto) block sizing path: >=4 grid steps, ragged tail.
    out3 = jax.block_until_ready(sigmoid_prod_pooling(x2, w, b))
    assert out3.shape == (batch2, 1), out3.shape
    assert jnp.allclose(out3, ref2, atol=1e-5, rtol=1e-5)

    print("KERNEL_OK")
</pallas_src>

<mosaic_0001>
module attributes {stable_mosaic.version = 11 : i64} {
  func.func @_sigmoid_prod_pool_kernel(%arg0: i32, %arg1: memref<2x160xf32, #tpu.memory_space<vmem>>, %arg2: memref<1x32xf32, #tpu.memory_space<vmem>>, %arg3: memref<1x1xf32, #tpu.memory_space<smem>>, %arg4: memref<1x1x2xf32, #tpu.memory_space<vmem>>) attributes {dimension_semantics = [#tpu.dimension_semantics<parallel>], iteration_bounds = array<i64: 1>, scalar_prefetch = 0 : i64, scratch_operands = 0 : i64, tpu.core_type = #tpu.core_type<tc>, window_params = [{transform_indices = @transform_0, window_bounds = array<i64: 2, 160>}, {pipeline_mode = #tpu.pipeline_mode<synchronous>, transform_indices = @transform_1, window_bounds = array<i64: 1, 32>}, {transform_indices = @transform_2, window_bounds = array<i64: 1, 1>}, {transform_indices = @transform_3, window_bounds = array<i64: 1, 1, 2>}]} {
    %c0 = arith.constant 0 : index
    %c0_0 = arith.constant 0 : index
    %0 = vector.load %arg2[%c0, %c0_0] : memref<1x32xf32, #tpu.memory_space<vmem>>, vector<1x32xf32>
    %c0_1 = arith.constant 0 : index
    %c0_2 = arith.constant 0 : index
    %1 = memref.load %arg3[%c0_1, %c0_2] : memref<1x1xf32, #tpu.memory_space<smem>>
    %cst = arith.constant 0.000000e+00 : f32
    %2 = vector.broadcast %cst : f32 to vector<2x1xf32>
    %c0_3 = arith.constant 0 : index
    %c0_4 = arith.constant 0 : index
    %3 = vector.load %arg1[%c0_3, %c0_4] : memref<2x160xf32, #tpu.memory_space<vmem>>, vector<2x32xf32>
    %4 = vector.broadcast %0 : vector<1x32xf32> to vector<2x32xf32>
    %5 = arith.mulf %3, %4 : vector<2x32xf32>
    %cst_5 = arith.constant dense<0.000000e+00> : vector<2xf32>
    %6 = vector.multi_reduction <add>, %5, %cst_5 [1] : vector<2x32xf32> to vector<2xf32>
    %7 = vector.shape_cast %6 : vector<2xf32> to vector<2x1xf32>
    %8 = vector.broadcast %1 : f32 to vector<2x1xf32>
    %9 = arith.addf %7, %8 : vector<2x1xf32>
    %cst_6 = arith.constant 0.000000e+00 : f32
    %10 = vector.broadcast %cst_6 : f32 to vector<2x1xf32>
    %11 = arith.maximumf %9, %10 : vector<2x1xf32>
    %12 = vector.broadcast %cst_6 : f32 to vector<2x1xf32>
    %13 = arith.subf %9, %12 : vector<2x1xf32>
    %14 = arith.cmpf one, %13, %13 : vector<2x1xf32>
    %15 = vector.broadcast %cst_6 : f32 to vector<2x1xf32>
    %16 = arith.addf %9, %15 : vector<2x1xf32>
    %17 = math.absf %13 : vector<2x1xf32>
    %cst_7 = arith.constant 0.000000e+00 : f32
    %18 = vector.broadcast %cst_7 : f32 to vector<2x1xf32>
    %19 = arith.subf %18, %17 : vector<2x1xf32>
    %20 = math.exp %19 : vector<2x1xf32>
    %21 = math.log1p %20 : vector<2x1xf32>
    %22 = arith.addf %11, %21 : vector<2x1xf32>
    %23 = arith.select %14, %16, %22 : vector<2x1xi1>, vector<2x1xf32>
    %24 = arith.addf %2, %23 : vector<2x1xf32>
    %c0_8 = arith.constant 0 : index
    %c32 = arith.constant 32 : index
    %25 = vector.load %arg1[%c0_8, %c32] : memref<2x160xf32, #tpu.memory_space<vmem>>, vector<2x32xf32>
    %26 = vector.broadcast %0 : vector<1x32xf32> to vector<2x32xf32>
    %27 = arith.mulf %25, %26 : vector<2x32xf32>
    %cst_9 = arith.constant dense<0.000000e+00> : vector<2xf32>
    %28 = vector.multi_reduction <add>, %27, %cst_9 [1] : vector<2x32xf32> to vector<2xf32>
    %29 = vector.shape_cast %28 : vector<2xf32> to vector<2x1xf32>
    %30 = vector.broadcast %1 : f32 to vector<2x1xf32>
    %31 = arith.addf %29, %30 : vector<2x1xf32>
    %cst_10 = arith.constant 0.000000e+00 : f32
    %32 = vector.broadcast %cst_10 : f32 to vector<2x1xf32>
    %33 = arith.maximumf %31, %32 : vector<2x1xf32>
    %34 = vector.broadcast %cst_10 : f32 to vector<2x1xf32>
    %35 = arith.subf %31, %34 : vector<2x1xf32>
    %36 = arith.cmpf one, %35, %35 : vector<2x1xf32>
    %37 = vector.broadcast %cst_10 : f32 to vector<2x1xf32>
    %38 = arith.addf %31, %37 : vector<2x1xf32>
    %39 = math.absf %35 : vector<2x1xf32>
    %cst_11 = arith.constant 0.000000e+00 : f32
    %40 = vector.broadcast %cst_11 : f32 to vector<2x1xf32>
    %41 = arith.subf %40, %39 : vector<2x1xf32>
    %42 = math.exp %41 : vector<2x1xf32>
    %43 = math.log1p %42 : vector<2x1xf32>
    %44 = arith.addf %33, %43 : vector<2x1xf32>
    %45 = arith.select %36, %38, %44 : vector<2x1xi1>, vector<2x1xf32>
    %46 = arith.addf %24, %45 : vector<2x1xf32>
    %c0_12 = arith.constant 0 : index
    %c64 = arith.constant 64 : index
    %47 = vector.load %arg1[%c0_12, %c64] : memref<2x160xf32, #tpu.memory_space<vmem>>, vector<2x32xf32>
    %48 = vector.broadcast %0 : vector<1x32xf32> to vector<2x32xf32>
    %49 = arith.mulf %47, %48 : vector<2x32xf32>
    %cst_13 = arith.constant dense<0.000000e+00> : vector<2xf32>
    %50 = vector.multi_reduction <add>, %49, %cst_13 [1] : vector<2x32xf32> to vector<2xf32>
    %51 = vector.shape_cast %50 : vector<2xf32> to vector<2x1xf32>
    %52 = vector.broadcast %1 : f32 to vector<2x1xf32>
    %53 = arith.addf %51, %52 : vector<2x1xf32>
    %cst_14 = arith.constant 0.000000e+00 : f32
    %54 = vector.broadcast %cst_14 : f32 to vector<2x1xf32>
    %55 = arith.maximumf %53, %54 : vector<2x1xf32>
    %56 = vector.broadcast %cst_14 : f32 to vector<2x1xf32>
    %57 = arith.subf %53, %56 : vector<2x1xf32>
    %58 = arith.cmpf one, %57, %57 : vector<2x1xf32>
    %59 = vector.broadcast %cst_14 : f32 to vector<2x1xf32>
    %60 = arith.addf %53, %59 : vector<2x1xf32>
    %61 = math.absf %57 : vector<2x1xf32>
    %cst_15 = arith.constant 0.000000e+00 : f32
    %62 = vector.broadcast %cst_15 : f32 to vector<2x1xf32>
    %63 = arith.subf %62, %61 : vector<2x1xf32>
    %64 = math.exp %63 : vector<2x1xf32>
    %65 = math.log1p %64 : vector<2x1xf32>
    %66 = arith.addf %55, %65 : vector<2x1xf32>
    %67 = arith.select %58, %60, %66 : vector<2x1xi1>, vector<2x1xf32>
    %68 = arith.addf %46, %67 : vector<2x1xf32>
    %c0_16 = arith.constant 0 : index
    %c96 = arith.constant 96 : index
    %69 = vector.load %arg1[%c0_16, %c96] : memref<2x160xf32, #tpu.memory_space<vmem>>, vector<2x32xf32>
    %70 = vector.broadcast %0 : vector<1x32xf32> to vector<2x32xf32>
    %71 = arith.mulf %69, %70 : vector<2x32xf32>
    %cst_17 = arith.constant dense<0.000000e+00> : vector<2xf32>
    %72 = vector.multi_reduction <add>, %71, %cst_17 [1] : vector<2x32xf32> to vector<2xf32>
    %73 = vector.shape_cast %72 : vector<2xf32> to vector<2x1xf32>
    %74 = vector.broadcast %1 : f32 to vector<2x1xf32>
    %75 = arith.addf %73, %74 : vector<2x1xf32>
    %cst_18 = arith.constant 0.000000e+00 : f32
    %76 = vector.broadcast %cst_18 : f32 to vector<2x1xf32>
    %77 = arith.maximumf %75, %76 : vector<2x1xf32>
    %78 = vector.broadcast %cst_18 : f32 to vector<2x1xf32>
    %79 = arith.subf %75, %78 : vector<2x1xf32>
    %80 = arith.cmpf one, %79, %79 : vector<2x1xf32>
    %81 = vector.broadcast %cst_18 : f32 to vector<2x1xf32>
    %82 = arith.addf %75, %81 : vector<2x1xf32>
    %83 = math.absf %79 : vector<2x1xf32>
    %cst_19 = arith.constant 0.000000e+00 : f32
    %84 = vector.broadcast %cst_19 : f32 to vector<2x1xf32>
    %85 = arith.subf %84, %83 : vector<2x1xf32>
    %86 = math.exp %85 : vector<2x1xf32>
    %87 = math.log1p %86 : vector<2x1xf32>
    %88 = arith.addf %77, %87 : vector<2x1xf32>
    %89 = arith.select %80, %82, %88 : vector<2x1xi1>, vector<2x1xf32>
    %90 = arith.addf %68, %89 : vector<2x1xf32>
    %c0_20 = arith.constant 0 : index
    %c128 = arith.constant 128 : index
    %91 = vector.load %arg1[%c0_20, %c128] : memref<2x160xf32, #tpu.memory_space<vmem>>, vector<2x32xf32>
    %92 = vector.broadcast %0 : vector<1x32xf32> to vector<2x32xf32>
    %93 = arith.mulf %91, %92 : vector<2x32xf32>
    %cst_21 = arith.constant dense<0.000000e+00> : vector<2xf32>
    %94 = vector.multi_reduction <add>, %93, %cst_21 [1] : vector<2x32xf32> to vector<2xf32>
    %95 = vector.shape_cast %94 : vector<2xf32> to vector<2x1xf32>
    %96 = vector.broadcast %1 : f32 to vector<2x1xf32>
    %97 = arith.addf %95, %96 : vector<2x1xf32>
    %cst_22 = arith.constant 0.000000e+00 : f32
    %98 = vector.broadcast %cst_22 : f32 to vector<2x1xf32>
    %99 = arith.maximumf %97, %98 : vector<2x1xf32>
    %100 = vector.broadcast %cst_22 : f32 to vector<2x1xf32>
    %101 = arith.subf %97, %100 : vector<2x1xf32>
    %102 = arith.cmpf one, %101, %101 : vector<2x1xf32>
    %103 = vector.broadcast %cst_22 : f32 to vector<2x1xf32>
    %104 = arith.addf %97, %103 : vector<2x1xf32>
    %105 = math.absf %101 : vector<2x1xf32>
    %cst_23 = arith.constant 0.000000e+00 : f32
    %106 = vector.broadcast %cst_23 : f32 to vector<2x1xf32>
    %107 = arith.subf %106, %105 : vector<2x1xf32>
    %108 = math.exp %107 : vector<2x1xf32>
    %109 = math.log1p %108 : vector<2x1xf32>
    %110 = arith.addf %99, %109 : vector<2x1xf32>
    %111 = arith.select %102, %104, %110 : vector<2x1xi1>, vector<2x1xf32>
    %112 = arith.addf %90, %111 : vector<2x1xf32>
    %cst_24 = arith.constant 0.000000e+00 : f32
    %113 = vector.broadcast %cst_24 : f32 to vector<2x1xf32>
    %114 = arith.subf %113, %112 : vector<2x1xf32>
    %115 = math.exp %114 : vector<2x1xf32>
    %cst_25 = arith.constant 1.000000e+00 : f32
    %116 = vector.broadcast %cst_25 : f32 to vector<2x1xf32>
    %117 = arith.subf %116, %115 : vector<2x1xf32>
    %118 = tpu.transpose %117, [1, 0] : vector<2x1xf32> -> vector<1x2xf32>
    %119 = vector.shape_cast %118 : vector<1x2xf32> to vector<1x1x2xf32>
    %c0_26 = arith.constant 0 : index
    %c0_27 = arith.constant 0 : index
    %c0_28 = arith.constant 0 : index
    %120 = vector.load %arg4[%c0_26, %c0_27, %c0_28] : memref<1x1x2xf32, #tpu.memory_space<vmem>>, vector<1x1x2xf32>
    tpu.vector_store %arg4[%c0_26, %c0_27, %c0_28], %119 {strides = array<i32>} : memref<1x1x2xf32, #tpu.memory_space<vmem>>, vector<1x1x2xf32>,
    return
  }
  func.func @transform_0(%arg0: i32) -> (i32, i32) {
    %c0_i32 = arith.constant 0 : i32
    %c0_i32_0 = arith.constant 0 : i32
    return %arg0, %c0_i32 : i32, i32
  }
  func.func @transform_1(%arg0: i32) -> (i32, i32) {
    %c0_i32 = arith.constant 0 : i32
    %c0_i32_0 = arith.constant 0 : i32
    %c0_i32_1 = arith.constant 0 : i32
    return %c0_i32, %c0_i32_0 : i32, i32
  }
  func.func @transform_2(%arg0: i32) -> (i32, i32) {
    %c0_i32 = arith.constant 0 : i32
    %c0_i32_0 = arith.constant 0 : i32
    %c0_i32_1 = arith.constant 0 : i32
    return %c0_i32, %c0_i32_0 : i32, i32
  }
  func.func @transform_3(%arg0: i32) -> (i32, i32, i32) {
    %c0_i32 = arith.constant 0 : i32
    %c0_i32_0 = arith.constant 0 : i32
    %c0_i32_1 = arith.constant 0 : i32
    return %arg0, %c0_i32, %c0_i32_0 : i32, i32, i32
  }
}

</mosaic_0001>

<bundles_post_ra>
// kernel: tpu_custom_call.1
= control target key start
LH: loop header
LB: loop body
LE: loop exit
PB: predicated region body
PF: predicated region fallthrough
CT: control target
= control target key end

     0   :  { %9 = vsyncpa [#allocation4], 0  ;;  %s437_s0 = inlined_call_operand.hbm [shape: f32[2,160], index: 0, kind: input, shape index: {}]   ;;  %s438_s1 = inlined_call_operand.vmem [shape: f32[1,32], index: 1, kind: input, shape index: {}]   ;;  %s439_s2 = inlined_call_operand.<no memory space> [shape: f32[1,1], index: 2, kind: input, shape index: {}]   ;;  %s440_s3 = inlined_call_operand.hbm [shape: f32[1,1,2], index: 3, kind: output, shape index: {}]  }
   0x1   :  { %10 = vsyncpa [#allocation5], 0  ;;  %s340_s12 = smov [#allocation3]   ;;  %s292_s16 = scalar_lea.hbm %s437_s0, 64 }
   0x2   :  { %s17_s13 = sshll.u32 %s340_s12, 4  ;;  %p293_p0 = scmp.ne.s32.totalorder %s437_s0, %s292_s16  ;;  %s18_s13 = int_to_ptr.vmem [resolvable:$true] %s17_s13 }
   0x3   :  { %p296_p1 = scmp.lt.u32.totalorder %s292_s16, %s437_s0 }
   0x5   :  { %p298_p2 = pnand %p296_p1, %p293_p0 }
   0x7   :  { %301 = shalt.err (!%p298_p2)
}
   0x8   :  { %s302_s21 = scalar_lea.vmem %s18_s13, 64  ;;  %p307_p4 = scmp.lt.s32.totalorder %s18_s13, %s18_s13 }
   0x9   :  { %p303_p3 = scmp.ne.s32.totalorder %s18_s13, %s302_s21  ;;  %p308_p5 = scmp.lt.s32.totalorder %s302_s21, %s302_s21 }
   0xb   :  { %p309_p6 = por %p308_p5, %p307_p4 }
   0xd   :  { %p310_p7 = pnand %p309_p6, %p303_p3 }
   0xf   :  { %313 = shalt.err (!%p310_p7)
}
  0x10   :  { %20 = dma.hbm_to_vmem [thread:$0]  %s437_s0, 64, %s18_s13, [#allocation4]  }
  0x11   :  { %336 = dma.done.wait [#allocation4], 64  }
  0x12   :  { %337 = vsyncadd [#allocation4], 4294967232  ;;  %v66_v0 = vlaneseq  ;;  %v341_v1 = vmov 1983009808   ;;  %v262_v6 = vld [vmem:[%s438_s1] ss:$0 sm:$0xff]  ;;  %v42_v29 = vstv %s439_s2 }
  0x13   :  { %v64_v2 = vunpack.c.l.s4 %v341_v1  ;;  %s342_s26 = smov 32   ;;  %s343_s27 = smov 96   ;;  %v30_v8 = vld [vmem:[#allocation3] sm:$0x3]  ;;  %vm38_vm0 = vcmask 254976   ;;  %vm245_vm11 = vcmask 8192  }
  0x14   :  { %v67_v3 = vshrl.u32 %v66_v0, 7  ;;  %s344_s28 = smov 64   ;;  %v37_v18 = vmul.f32 %v262_v6, %v30_v8  ;;  %v184_v20 = vld [vmem:[#allocation3 + $0x2] sm:$0x3]  ;;  %s345_s2 = smov [#allocation6]  }
  0x15   :  { %v65_v4 = vunpack.c.0.s8 %v64_v2  ;;  %v185_v21 = vmul.f32 %v262_v6, %v184_v20  ;;  %s253_s29 = sshll.u32 %s345_s2, 4  ;;  %s254_s29 = int_to_ptr.vmem [resolvable:$true] %s253_s29 }
  0x16   :  { %v39_v19 = vsel %vm38_vm0, %v37_v18, 0.0  ;;  %s314_s30 = scalar_lea.vmem %s254_s29, 16  ;;  %s318_s4 = scalar_lea.vmem %s254_s29, 32 }
  0x17   :  { %v68_v5 = vsub.s32 %v65_v4, %v67_v3  ;;  %v186_v24 = vsel %vm38_vm0, %v185_v21, 0.0  ;;  %p315_p8 = scmp.ne.s32.totalorder %s254_s29, %s314_s30  ;;  %p319_p9 = scmp.lt.s32.totalorder %s254_s29, %s254_s29 }
  0x18   :  { %p320_p10 = scmp.lt.s32.totalorder %s318_s4, %s314_s30 }
  0x19   :  { %v69_v7 = vrot.slane %v262_v6, %v68_v5 }
  0x1a   :  { %p321_p11 = por %p320_p10, %p319_p9 }
  0x1b   :  { %70 = vrot.lane.b32.xlu0 %v69_v7, %s342_s26  ;;  %146 = vrot.lane.b32.xlu1 %v69_v7, %s343_s27 }
  0x1c   :  { %p322_p12 = pnand %p321_p11, %p315_p8 }
  0x1f   :  { %108 = vrot.lane.b32.xlu0 %v69_v7, %s344_s28 }
  0x8d   :  { %v71_v9 = vpop.permute.xlu0 %70  ;;  %v147_v10 = vpop.permute.xlu1 %146 }
  0x8e   :  { %v73_v11 = vmul.f32 %v71_v9, %v30_v8  ;;  %v149_v12 = vmul.f32 %v147_v10, %v30_v8 }
  0x90   :  { %v81_v13 = vrot.slane %v73_v11, %v68_v5  ;;  %v157_v16 = vrot.slane %v149_v12, %v68_v5 }
  0x91   :  { %v109_v14 = vpop.permute.xlu0 %108 }
  0x92   :  { %v111_v15 = vmul.f32 %v109_v14, %v30_v8  ;;  %82 = vrot.lane.b32.xlu1 %v81_v13, %s343_s27 }
  0x94   :  { %v119_v17 = vrot.slane %v111_v15, %v68_v5 }
  0x96   :  { %120 = vrot.lane.b32.xlu0 %v119_v17, %s344_s28  ;;  %158 = vrot.lane.b32.xlu1 %v157_v16, %s342_s26 }
  0xb5   :  { %40 = vadd.xlane.f32.xlu0 %v39_v19 }
 0x104   :  { %v83_v22 = vpop.permute.xlu1 %82 }
 0x105   :  { %v85_v23 = vsel %vm38_vm0, %v83_v22, 0.0 }
 0x106   :  { %86 = vadd.xlane.f32.xlu1 %v85_v23 }
 0x108   :  { %v121_v25 = vpop.permute.xlu0 %120  ;;  %v159_v26 = vpop.permute.xlu1 %158 }
 0x109   :  { %v123_v27 = vsel %vm38_vm0, %v121_v25, 0.0  ;;  %v161_v28 = vsel %vm38_vm0, %v159_v26, 0.0 }
 0x10a   :  { %187 = vadd.xlane.f32.xlu1 %v186_v24  ;;  %124 = vadd.xlane.f32.xlu0 %v123_v27 }
 0x10e   :  { %162 = vadd.xlane.f32.xlu0 %v161_v28 }
 0x142   :  { %v41_v30 = vpop.xlane.xlu0 %40 }
 0x143   :  { %v384_v31 = vadd.f32 %v42_v29, %v41_v30 }
 0x145   :  { %v47_v32 = vand.u32 2147483647, %v384_v31  ;;  %v44_v14 = vmax.f32 %v384_v31, 0.0  ;;  %vm45_vm3 = vcmp.ne.f32.partialorder %v384_v31, %v384_v31 }
 0x147   :  { %v48_v33 = vsub.f32 0.0, %v47_v32 }
 0x149   :  { %v49_v34 = vmul.f32 1.442695, %v48_v33 }
 0x14b   :  { %270 = vpow2.f32 %v49_v34 }
 0x155   :  { %v271_v47 = vpop.eup %270 }
 0x156   :  { %v51_v53 = vadd.f32 1.0, %v271_v47  ;;  %v54_v59 = vmul.f32 -0.5, %v271_v47  ;;  %v57_v3 = vand.u32 2147483647, %v271_v47 }
 0x158   :  { %v55_v63 = vadd.f32 1.0, %v54_v59  ;;  %vm399_vm1 = vcmp.lt.f32.partialorder %v57_v3, 0.0004427343 }
 0x15a   :  { %v56_v7 = vmul.f32 %v271_v47, %v55_v63 }
 0x193   :  { %v87_v35 = vpop.xlane.xlu1 %86 }
 0x194   :  { %v387_v36 = vadd.f32 %v87_v35, %v42_v29 }
 0x196   :  { %v92_v37 = vand.u32 2147483647, %v387_v36  ;;  %v89_v19 = vmax.f32 %v387_v36, 0.0  ;;  %vm90_vm4 = vcmp.ne.f32.partialorder %v387_v36, %v387_v36 }
 0x197   :  { %v188_v38 = vpop.xlane.xlu1 %187  ;;  %v125_v39 = vpop.xlane.xlu0 %124 }
 0x198   :  { %v93_v40 = vsub.f32 0.0, %v92_v37  ;;  %v390_v41 = vadd.f32 %v188_v38, %v42_v29  ;;  %v392_v42 = vadd.f32 %v125_v39, %v42_v29 }
 0x19a   :  { %v94_v43 = vmul.f32 1.442695, %v93_v40  ;;  %v193_v44 = vand.u32 2147483647, %v390_v41  ;;  %v130_v45 = vand.u32 2147483647, %v392_v42  ;;  %vm128_vm7 = vcmp.ne.f32.partialorder %v392_v42, %v392_v42 }
 0x19b   :  { %v163_v46 = vpop.xlane.xlu0 %162  ;;  %v127_v37 = vmax.f32 %v392_v42, 0.0  ;;  %vm191_vm10 = vcmp.ne.f32.partialorder %v390_v41, %v390_v41 }
 0x19c   :  { %272 = vpow2.f32 %v94_v43  ;;  %v194_v48 = vsub.f32 0.0, %v193_v44  ;;  %v396_v49 = vadd.f32 %v163_v46, %v42_v29  ;;  %v131_v50 = vsub.f32 0.0, %v130_v45 }
 0x19e   :  { %v195_v51 = vmul.f32 1.442695, %v194_v48  ;;  %v168_v52 = vand.u32 2147483647, %v396_v49  ;;  %v132_v54 = vmul.f32 1.442695, %v131_v50  ;;  %vm166_vm9 = vcmp.ne.f32.partialorder %v396_v49, %v396_v49 }
 0x19f   :  { %v190_v48 = vmax.f32 %v390_v41, 0.0  ;;  %v165_v50 = vmax.f32 %v396_v49, 0.0 }
 0x1a0   :  { %274 = vpow2.f32 %v195_v51  ;;  %v169_v55 = vsub.f32 0.0, %v168_v52 }
 0x1a1   :  { %276 = vpow2.f32 %v132_v54 }
 0x1a2   :  { %v170_v56 = vmul.f32 1.442695, %v169_v55  ;;  %278 = vlog2.f32 %v51_v53 }
 0x1a4   :  { %280 = vpow2.f32 %v170_v56 }
 0x1a6   :  { %v273_v57 = vpop.eup %272 }
 0x1a7   :  { %v96_v58 = vadd.f32 1.0, %v273_v57  ;;  %v99_v0 = vmul.f32 -0.5, %v273_v57  ;;  %v102_v10 = vand.u32 2147483647, %v273_v57 }
 0x1a9   :  { %282 = vlog2.f32 %v96_v58  ;;  %v100_v8 = vadd.f32 1.0, %v99_v0  ;;  %vm103_vm2 = vcmp.lt.f32.partialorder %v102_v10, 0.0004427343 }
 0x1aa   :  { %v275_v60 = vpop.eup %274 }
 0x1ab   :  { %v277_v61 = vpop.eup %276  ;;  %v197_v62 = vadd.f32 1.0, %v275_v60  ;;  %v200_v12 = vmul.f32 -0.5, %v275_v60  ;;  %v101_v17 = vmul.f32 %v273_v57, %v100_v8  ;;  %v203_v27 = vand.u32 2147483647, %v275_v60 }
 0x1ac   :  { %v134_v1 = vadd.f32 1.0, %v277_v61  ;;  %v279_v2 = vpop.eup %278  ;;  %v137_v11 = vmul.f32 -0.5, %v277_v61  ;;  %v140_v23 = vand.u32 2147483647, %v277_v61 }
 0x1ad   :  { %284 = vlog2.f32 %v197_v62  ;;  %v53_v6 = vmul.f32 0.6931472, %v279_v2  ;;  %v201_v22 = vadd.f32 1.0, %v200_v12  ;;  %vm204_vm6 = vcmp.lt.f32.partialorder %v203_v27, 0.0004427343 }
 0x1ae   :  { %v281_v4 = vpop.eup %280  ;;  %286 = vlog2.f32 %v134_v1  ;;  %v138_v20 = vadd.f32 1.0, %v137_v11  ;;  %vm141_vm5 = vcmp.lt.f32.partialorder %v140_v23, 0.0004427343 }
 0x1af   :  { %v172_v5 = vadd.f32 1.0, %v281_v4  ;;  %v59_v15 = vsel %vm399_vm1, %v56_v7, %v53_v6  ;;  %v175_v18 = vmul.f32 -0.5, %v281_v4  ;;  %v178_v34 = vand.u32 2147483647, %v281_v4 }
 0x1b0   :  { %v60_v25 = vadd.f32 %v59_v15, %v44_v14  ;;  %v139_v33 = vmul.f32 %v277_v61, %v138_v20  ;;  %v202_v35 = vmul.f32 %v275_v60, %v201_v22 }
 0x1b1   :  { %288 = vlog2.f32 %v172_v5  ;;  %v176_v30 = vadd.f32 1.0, %v175_v18  ;;  %vm179_vm8 = vcmp.lt.f32.partialorder %v178_v34, 0.0004427343 }
 0x1b2   :  { %v61_v39 = vsel %vm45_vm3, %v384_v31, %v60_v25 }
 0x1b3   :  { %v283_v13 = vpop.eup %282  ;;  %v177_v47 = vmul.f32 %v281_v4, %v176_v30 }
 0x1b4   :  { %v98_v16 = vmul.f32 0.6931472, %v283_v13 }
 0x1b6   :  { %v104_v21 = vsel %vm103_vm2, %v101_v17, %v98_v16 }
 0x1b7   :  { %v285_v24 = vpop.eup %284  ;;  %v105_v26 = vadd.f32 %v104_v21, %v89_v19 }
 0x1b8   :  { %v287_v28 = vpop.eup %286  ;;  %v199_v29 = vmul.f32 0.6931472, %v285_v24 }
 0x1b9   :  { %v136_v32 = vmul.f32 0.6931472, %v287_v28  ;;  %v106_v40 = vsel %vm90_vm4, %v387_v36, %v105_v26 }
 0x1ba   :  { %v205_v44 = vsel %vm204_vm6, %v202_v35, %v199_v29  ;;  %v107_v51 = vadd.f32 %v106_v40, %v61_v39 }
 0x1bb   :  { %v289_v38 = vpop.eup %288  ;;  %v142_v43 = vsel %vm141_vm5, %v139_v33, %v136_v32  ;;  %v206_v53 = vadd.f32 %v205_v44, %v190_v48 }
 0x1bc   :  { %v143_v45 = vadd.f32 %v142_v43, %v127_v37  ;;  %v174_v46 = vmul.f32 0.6931472, %v289_v38 }
 0x1bd   :  { %v207_v57 = vsel %vm191_vm10, %v390_v41, %v206_v53 }
 0x1be   :  { %v144_v52 = vsel %vm128_vm7, %v392_v42, %v143_v45  ;;  %v180_v31 = vsel %vm179_vm8, %v177_v47, %v174_v46 }
 0x1bf   :  { %v181_v36 = vadd.f32 %v180_v31, %v165_v50  ;;  %v145_v54 = vadd.f32 %v144_v52, %v107_v51 }
 0x1c1   :  { %v182_v55 = vsel %vm166_vm9, %v396_v49, %v181_v36 }
 0x1c2   :  { %v183_v56 = vadd.f32 %v182_v55, %v145_v54 }
 0x1c4   :  { %v208_v58 = vadd.f32 %v207_v57, %v183_v56 }
 0x1c6   :  { %v209_v59 = vsub.f32 0.0, %v208_v58 }
 0x1c8   :  { %v210_v60 = vmul.f32 1.442695, %v209_v59 }
 0x1ca   :  { %290 = vpow2.f32 %v210_v60 }
 0x1d4   :  { %v291_v42 = vpop.eup %290 }
 0x1d5   :  { %v212_v61 = vsub.f32 1.0, %v291_v42 }
 0x1d7   :  { %213 = vxpose.xlu0.b32.start.end [1/1] (short) (narrow) %v212_v61, 8 }
 0x257   :  { %v229_v62 = vpop.trf.xlu0 }
 0x258   :  { %246 = vst.msk [vmem:[#allocation6] sm:$0x1] %vm245_vm11, %v229_v62 }
 0x259   :  { %325 = shalt.err (!%p322_p12)
}
 0x25a   :  { %s326_s7 = scalar_lea.hbm %s440_s3, 16 }
 0x25b   :  { %p327_p13 = scmp.ne.s32.totalorder %s440_s3, %s326_s7  ;;  %p330_p0 = scmp.lt.u32.totalorder %s326_s7, %s440_s3 }
 0x25d   :  { %p332_p1 = pnand %p330_p0, %p327_p13 }
 0x25f   :  { %335 = shalt.err (!%p332_p1)
}
 0x260   :  { %256 = dma.vmem_to_hbm [thread:$0]  %s254_s29, 16, %s440_s3, [#allocation5]  }
 0x261   :  { %338 = dma.done.wait [#allocation5], 16  }
 0x262   :  { %339 = vsyncadd [#allocation5], 4294967280 }
 0x263   :  { %260 = vsyncpa [#allocation4], 1 }
 0x264   :  { %261 = vsyncpa [#allocation5], 1 }

</bundles_post_ra>
